<compile_context>
chip_gen: v7x
topology: tpu7x:2x2x1
jax: 0.10.0
libtpu: 0.0.40
codegen_flags: <defaults>
</compile_context>

<pallas_src>
import jax
import jax.numpy as jnp
from jax.experimental import pallas as pl
from jax.experimental.pallas import tpu as pltpu  # noqa: F401  (TPU-specific hooks if a grid is added later)


# --------------------------------------------------------------------------
# Configuration (small shapes consistent with the module)
# --------------------------------------------------------------------------
BATCH          = 8
REPR_DIM       = 64
FEATURE_DIM    = 32
HIDDEN_DIM     = 32
ACTION_DIM     = 4
HIDDEN_DEPTH   = 2                  # utils.mlp: Lin-ReLU, Lin-ReLU, Lin
LOG_STD_BOUNDS = (-10.0, 2.0)
LN_EPS         = 1e-5
LANE           = 128                # TPU lane width: every slab is padded to this


# --------------------------------------------------------------------------
# Pallas kernel: whole forward pass fused in VMEM (arrays are tiny)
# --------------------------------------------------------------------------
def actor_kernel(obs_ref, w_pre_ref, w_stack_ref, bias_ref, out_ref):
    # bias_ref rows: 0=b_pre 1=ln_gamma 2=ln_beta 3=b1 4=b2 5=b3 (lane-padded with 0)
    b_pre = bias_ref[0:1, :]
    ln_g  = bias_ref[1:2, :]
    ln_b  = bias_ref[2:3, :]
    b1    = bias_ref[3:4, :]
    b2    = bias_ref[4:5, :]
    b3    = bias_ref[5:6, :]

    # pre_fc Linear: (B, repr) @ (repr, 128-padded) on the MXU, bf16 in / f32 acc.
    obs = obs_ref[...].astype(jnp.bfloat16)
    h = jnp.dot(obs, w_pre_ref[...], preferred_element_type=jnp.float32) + b_pre

    # LayerNorm(feature_dim): fused single-pass statistics.  Padding lanes of h
    # are exactly zero, so summing all 128 lanes / FEATURE_DIM gives the real
    # mean / E[h^2]; the two reductions are independent (no dependent reduce).
    inv_f = 1.0 / FEATURE_DIM
    mean = jnp.sum(h, axis=-1, keepdims=True) * inv_f
    ex2  = jnp.sum(h * h, axis=-1, keepdims=True) * inv_f
    var  = ex2 - mean * mean
    h = (h - mean) * jax.lax.rsqrt(var + LN_EPS)
    h = h * ln_g + ln_b          # gamma/beta padding is 0 -> padding lanes back to exact 0

    # fc = utils.mlp(feature_dim, hidden_dim, 2*action_dim, hidden_depth=2)
    x = jnp.dot(h.astype(jnp.bfloat16), w_stack_ref[0],
                preferred_element_type=jnp.float32) + b1
    x = jnp.maximum(x, 0.0)
    x = jnp.dot(x.astype(jnp.bfloat16), w_stack_ref[1],
                preferred_element_type=jnp.float32) + b2
    x = jnp.maximum(x, 0.0)
    out = jnp.dot(x.astype(jnp.bfloat16), w_stack_ref[2],
                  preferred_element_type=jnp.float32) + b3
    # out lanes: [0,A) = mu, [A,2A) = raw log_std, [2A,128) = exact zeros.

    # tanh-bound log_std, std = exp(log_std).  Computed on the full vreg (EUP
    # has slack) and merged with mu via a lane-index select -> one unmasked,
    # lane-dense store instead of two masked 4-lane stores.
    lo, hi = LOG_STD_BOUNDS
    log_std = lo + 0.5 * (hi - lo) * (jnp.tanh(out) + 1.0)
    std = jnp.exp(log_std)
    lane = jax.lax.broadcasted_iota(jnp.int32, out.shape, 1)
    is_std = (lane >= ACTION_DIM) & (lane < 2 * ACTION_DIM)
    out_ref[...] = jnp.where(is_std, std, out)


# --------------------------------------------------------------------------
# One-time parameter packing into lane-dense slabs (3 param DMAs total)
# --------------------------------------------------------------------------
def pack_params(p):
    def lane_pad_vec(v):
        return jnp.pad(v, (0, LANE - v.shape[0]))

    def lane_pad_mat(w):
        return jnp.pad(w, ((0, LANE - w.shape[0]), (0, LANE - w.shape[1])))

    bias_pack = jnp.stack(
        [lane_pad_vec(p["b_pre"]), lane_pad_vec(p["ln_g"]), lane_pad_vec(p["ln_b"]),
         lane_pad_vec(p["b1"]), lane_pad_vec(p["b2"]), lane_pad_vec(p["b3"]),
         jnp.zeros((LANE,), jnp.float32), jnp.zeros((LANE,), jnp.float32)],
        axis=0)                                                      # (8, 128) f32

    w_pre = jnp.pad(p["w_pre"],
                    ((0, 0), (0, LANE - p["w_pre"].shape[1]))
                    ).astype(jnp.bfloat16)                           # (64, 128) bf16

    w_stack = jnp.stack([lane_pad_mat(p["w1"]),
                         lane_pad_mat(p["w2"]),
                         lane_pad_mat(p["w3"])]).astype(jnp.bfloat16)  # (3, 128, 128) bf16
    return w_pre, w_stack, bias_pack


def actor_forward(obs, packed):
    """Returns (mu, std) — the parameters of SquashedNormal(mu, std)."""
    w_pre, w_stack, bias_pack = packed
    B = obs.shape[0]

    full = lambda a: pl.BlockSpec(a.shape, lambda *_: (0,) * a.ndim)
    args = (obs, w_pre, w_stack, bias_pack)

    flops = 2 * B * (REPR_DIM * FEATURE_DIM
                     + FEATURE_DIM * HIDDEN_DIM
                     + HIDDEN_DIM * HIDDEN_DIM
                     + HIDDEN_DIM * 2 * ACTION_DIM)
    bytes_accessed = sum(int(a.size) * a.dtype.itemsize for a in args) + B * LANE * 4
    cost = pl.CostEstimate(flops=flops,
                           transcendentals=2 * B * LANE + B,   # tanh + exp + rsqrt
                           bytes_accessed=bytes_accessed)

    # NOTE: gridless on purpose — at BATCH=8 a grid only adds per-step overhead.
    # If BATCH grows past ~128, tile the batch dim with a (128, ·) block and use
    # dimension_semantics=("parallel",) so v7x can shard it across both cores.
    out_full = pl.pallas_call(
        actor_kernel,
        out_shape=jax.ShapeDtypeStruct((B, LANE), jnp.float32),
        in_specs=[full(a) for a in args],
        out_specs=pl.BlockSpec((B, LANE), lambda *_: (0, 0)),
        cost_estimate=cost,
    )(*args)

    mu = out_full[:, :ACTION_DIM]
    std = out_full[:, ACTION_DIM:2 * ACTION_DIM]
    return mu, std


# --------------------------------------------------------------------------
# Deterministic parameter init (synthetic; shapes from Actor.__init__)
# --------------------------------------------------------------------------
def init_params(key):
    ks = jax.random.split(key, 8)
    scale = lambda fan_in: 1.0 / jnp.sqrt(jnp.float32(fan_in))
    return {
        "w_pre": jax.random.normal(ks[0], (REPR_DIM, FEATURE_DIM), jnp.float32) * scale(REPR_DIM),
        "b_pre": jnp.zeros((FEATURE_DIM,), jnp.float32),
        "ln_g":  jnp.ones((FEATURE_DIM,), jnp.float32),
        "ln_b":  jnp.zeros((FEATURE_DIM,), jnp.float32),
        "w1": jax.random.normal(ks[1], (FEATURE_DIM, HIDDEN_DIM), jnp.float32) * scale(FEATURE_DIM),
        "b1": jnp.zeros((HIDDEN_DIM,), jnp.float32),
        "w2": jax.random.normal(ks[2], (HIDDEN_DIM, HIDDEN_DIM), jnp.float32) * scale(HIDDEN_DIM),
        "b2": jnp.zeros((HIDDEN_DIM,), jnp.float32),
        "w3": jax.random.normal(ks[3], (HIDDEN_DIM, 2 * ACTION_DIM), jnp.float32) * scale(HIDDEN_DIM),
        "b3": jnp.zeros((2 * ACTION_DIM,), jnp.float32),
    }


# --------------------------------------------------------------------------
# Pure-JAX reference (same bf16-weight / f32-accumulate matmul recipe)
# --------------------------------------------------------------------------
def actor_ref(obs, p):
    def mm(x, w):
        return jax.lax.dot(x.astype(jnp.bfloat16), w.astype(jnp.bfloat16),
                           preferred_element_type=jnp.float32)
    h = mm(obs, p["w_pre"]) + p["b_pre"]
    mean = h.mean(-1, keepdims=True)
    var = ((h - mean) ** 2).mean(-1, keepdims=True)
    h = (h - mean) * jax.lax.rsqrt(var + LN_EPS) * p["ln_g"] + p["ln_b"]
    x = jnp.maximum(mm(h, p["w1"]) + p["b1"], 0.0)
    x = jnp.maximum(mm(x, p["w2"]) + p["b2"], 0.0)
    out = mm(x, p["w3"]) + p["b3"]
    mu, log_std = out[:, :ACTION_DIM], out[:, ACTION_DIM:]
    log_std = jnp.tanh(log_std)
    lo, hi = LOG_STD_BOUNDS
    log_std = lo + 0.5 * (hi - lo) * (log_std + 1.0)
    return mu, jnp.exp(log_std)


if __name__ == "__main__":
    key = jax.random.PRNGKey(0)
    k_obs, k_param = jax.random.split(key)
    obs = jax.random.normal(k_obs, (BATCH, REPR_DIM), jnp.float32)
    params = init_params(k_param)
    packed = pack_params(params)

    mu, std = actor_forward(obs, packed)
    jax.block_until_ready((mu, std))

    mu_r, std_r = actor_ref(obs, params)
    assert mu.shape == (BATCH, ACTION_DIM) and std.shape == (BATCH, ACTION_DIM)
    assert jnp.allclose(mu, mu_r, atol=5e-3, rtol=5e-3), float(jnp.max(jnp.abs(mu - mu_r)))
    assert jnp.allclose(std, std_r, atol=5e-3, rtol=5e-3), float(jnp.max(jnp.abs(std - std_r)))

    print("KERNEL_OK")
</pallas_src>

<mosaic_0001>
module attributes {stable_mosaic.version = 11 : i64} {
  func.func @actor_kernel(%arg0: memref<8x64xf32, #tpu.memory_space<vmem>>, %arg1: memref<64x128xbf16, #tpu.memory_space<vmem>>, %arg2: memref<3x128x128xbf16, #tpu.memory_space<vmem>>, %arg3: memref<8x128xf32, #tpu.memory_space<vmem>>, %arg4: memref<8x128xf32, #tpu.memory_space<vmem>>) attributes {dimension_semantics = [], scalar_prefetch = 0 : i64, scratch_operands = 0 : i64, tpu.core_type = #tpu.core_type<tc>} {
    %c0 = arith.constant 0 : index
    %c0_0 = arith.constant 0 : index
    %0 = vector.load %arg3[%c0, %c0_0] : memref<8x128xf32, #tpu.memory_space<vmem>>, vector<1x128xf32>
    %c1 = arith.constant 1 : index
    %c0_1 = arith.constant 0 : index
    %1 = vector.load %arg3[%c1, %c0_1] : memref<8x128xf32, #tpu.memory_space<vmem>>, vector<1x128xf32>
    %c2 = arith.constant 2 : index
    %c0_2 = arith.constant 0 : index
    %2 = vector.load %arg3[%c2, %c0_2] : memref<8x128xf32, #tpu.memory_space<vmem>>, vector<1x128xf32>
    %c3 = arith.constant 3 : index
    %c0_3 = arith.constant 0 : index
    %3 = vector.load %arg3[%c3, %c0_3] : memref<8x128xf32, #tpu.memory_space<vmem>>, vector<1x128xf32>
    %c4 = arith.constant 4 : index
    %c0_4 = arith.constant 0 : index
    %4 = vector.load %arg3[%c4, %c0_4] : memref<8x128xf32, #tpu.memory_space<vmem>>, vector<1x128xf32>
    %c5 = arith.constant 5 : index
    %c0_5 = arith.constant 0 : index
    %5 = vector.load %arg3[%c5, %c0_5] : memref<8x128xf32, #tpu.memory_space<vmem>>, vector<1x128xf32>
    %c0_6 = arith.constant 0 : index
    %c0_7 = arith.constant 0 : index
    %6 = vector.load %arg0[%c0_6, %c0_7] : memref<8x64xf32, #tpu.memory_space<vmem>>, vector<8x64xf32>
    %7 = arith.truncf %6 : vector<8x64xf32> to vector<8x64xbf16>
    %c0_8 = arith.constant 0 : index
    %c0_9 = arith.constant 0 : index
    %8 = vector.load %arg1[%c0_8, %c0_9] : memref<64x128xbf16, #tpu.memory_space<vmem>>, vector<64x128xbf16>
    %cst = arith.constant dense<0.000000e+00> : vector<8x128xf32>
    %9 = tpu.matmul %7, %8, %cst {dimension_numbers = #tpu.dot_dimension_numbers<[1], [0], [0], [1], [0, 0, 1, 1], [], []>} : vector<8x64xbf16>, vector<64x128xbf16>, vector<8x128xf32> -> vector<8x128xf32>
    %10 = vector.broadcast %0 : vector<1x128xf32> to vector<8x128xf32>
    %11 = arith.addf %9, %10 : vector<8x128xf32>
    %cst_10 = arith.constant dense<0.000000e+00> : vector<8xf32>
    %12 = vector.multi_reduction <add>, %11, %cst_10 [1] : vector<8x128xf32> to vector<8xf32>
    %13 = vector.shape_cast %12 : vector<8xf32> to vector<8x1xf32>
    %cst_11 = arith.constant 3.125000e-02 : f32
    %14 = vector.broadcast %cst_11 : f32 to vector<8x1xf32>
    %15 = arith.mulf %13, %14 : vector<8x1xf32>
    %16 = arith.mulf %11, %11 : vector<8x128xf32>
    %cst_12 = arith.constant dense<0.000000e+00> : vector<8xf32>
    %17 = vector.multi_reduction <add>, %16, %cst_12 [1] : vector<8x128xf32> to vector<8xf32>
    %18 = vector.shape_cast %17 : vector<8xf32> to vector<8x1xf32>
    %cst_13 = arith.constant 3.125000e-02 : f32
    %19 = vector.broadcast %cst_13 : f32 to vector<8x1xf32>
    %20 = arith.mulf %18, %19 : vector<8x1xf32>
    %21 = arith.mulf %15, %15 : vector<8x1xf32>
    %22 = arith.subf %20, %21 : vector<8x1xf32>
    %23 = vector.broadcast %15 : vector<8x1xf32> to vector<8x128xf32>
    %24 = arith.subf %11, %23 : vector<8x128xf32>
    %cst_14 = arith.constant 9.99999974E-6 : f32
    %25 = vector.broadcast %cst_14 : f32 to vector<8x1xf32>
    %26 = arith.addf %22, %25 : vector<8x1xf32>
    %27 = math.rsqrt %26 : vector<8x1xf32>
    %28 = vector.broadcast %27 : vector<8x1xf32> to vector<8x128xf32>
    %29 = arith.mulf %24, %28 : vector<8x128xf32>
    %30 = vector.broadcast %1 : vector<1x128xf32> to vector<8x128xf32>
    %31 = arith.mulf %29, %30 : vector<8x128xf32>
    %32 = vector.broadcast %2 : vector<1x128xf32> to vector<8x128xf32>
    %33 = arith.addf %31, %32 : vector<8x128xf32>
    %34 = arith.truncf %33 : vector<8x128xf32> to vector<8x128xbf16>
    %c0_15 = arith.constant 0 : index
    %c0_16 = arith.constant 0 : index
    %c0_17 = arith.constant 0 : index
    %35 = vector.load %arg2[%c0_15, %c0_16, %c0_17] : memref<3x128x128xbf16, #tpu.memory_space<vmem>>, vector<1x128x128xbf16>
    %36 = vector.shape_cast %35 : vector<1x128x128xbf16> to vector<128x128xbf16>
    %cst_18 = arith.constant dense<0.000000e+00> : vector<8x128xf32>
    %37 = tpu.matmul %34, %36, %cst_18 {dimension_numbers = #tpu.dot_dimension_numbers<[1], [0], [0], [1], [0, 0, 1, 1], [], []>} : vector<8x128xbf16>, vector<128x128xbf16>, vector<8x128xf32> -> vector<8x128xf32>
    %38 = vector.broadcast %3 : vector<1x128xf32> to vector<8x128xf32>
    %39 = arith.addf %37, %38 : vector<8x128xf32>
    %cst_19 = arith.constant 0.000000e+00 : f32
    %40 = vector.broadcast %cst_19 : f32 to vector<8x128xf32>
    %41 = arith.maximumf %39, %40 : vector<8x128xf32>
    %42 = arith.truncf %41 : vector<8x128xf32> to vector<8x128xbf16>
    %c1_20 = arith.constant 1 : index
    %c0_21 = arith.constant 0 : index
    %c0_22 = arith.constant 0 : index
    %43 = vector.load %arg2[%c1_20, %c0_21, %c0_22] : memref<3x128x128xbf16, #tpu.memory_space<vmem>>, vector<1x128x128xbf16>
    %44 = vector.shape_cast %43 : vector<1x128x128xbf16> to vector<128x128xbf16>
    %cst_23 = arith.constant dense<0.000000e+00> : vector<8x128xf32>
    %45 = tpu.matmul %42, %44, %cst_23 {dimension_numbers = #tpu.dot_dimension_numbers<[1], [0], [0], [1], [0, 0, 1, 1], [], []>} : vector<8x128xbf16>, vector<128x128xbf16>, vector<8x128xf32> -> vector<8x128xf32>
    %46 = vector.broadcast %4 : vector<1x128xf32> to vector<8x128xf32>
    %47 = arith.addf %45, %46 : vector<8x128xf32>
    %cst_24 = arith.constant 0.000000e+00 : f32
    %48 = vector.broadcast %cst_24 : f32 to vector<8x128xf32>
    %49 = arith.maximumf %47, %48 : vector<8x128xf32>
    %50 = arith.truncf %49 : vector<8x128xf32> to vector<8x128xbf16>
    %c2_25 = arith.constant 2 : index
    %c0_26 = arith.constant 0 : index
    %c0_27 = arith.constant 0 : index
    %51 = vector.load %arg2[%c2_25, %c0_26, %c0_27] : memref<3x128x128xbf16, #tpu.memory_space<vmem>>, vector<1x128x128xbf16>
    %52 = vector.shape_cast %51 : vector<1x128x128xbf16> to vector<128x128xbf16>
    %cst_28 = arith.constant dense<0.000000e+00> : vector<8x128xf32>
    %53 = tpu.matmul %50, %52, %cst_28 {dimension_numbers = #tpu.dot_dimension_numbers<[1], [0], [0], [1], [0, 0, 1, 1], [], []>} : vector<8x128xbf16>, vector<128x128xbf16>, vector<8x128xf32> -> vector<8x128xf32>
    %54 = vector.broadcast %5 : vector<1x128xf32> to vector<8x128xf32>
    %55 = arith.addf %53, %54 : vector<8x128xf32>
    %56 = math.tanh %55 : vector<8x128xf32>
    %cst_29 = arith.constant 1.000000e+00 : f32
    %57 = vector.broadcast %cst_29 : f32 to vector<8x128xf32>
    %58 = arith.addf %56, %57 : vector<8x128xf32>
    %cst_30 = arith.constant 6.000000e+00 : f32
    %59 = vector.broadcast %cst_30 : f32 to vector<8x128xf32>
    %60 = arith.mulf %59, %58 : vector<8x128xf32>
    %cst_31 = arith.constant -1.000000e+01 : f32
    %61 = vector.broadcast %cst_31 : f32 to vector<8x128xf32>
    %62 = arith.addf %61, %60 : vector<8x128xf32>
    %63 = math.exp %62 : vector<8x128xf32>
    %64 = tpu.iota {dimensions = array<i32: 1>} : vector<8x128xi32>
    %c4_i32 = arith.constant 4 : i32
    %65 = vector.broadcast %c4_i32 : i32 to vector<8x128xi32>
    %66 = arith.cmpi sge, %64, %65 : vector<8x128xi32>
    %c8_i32 = arith.constant 8 : i32
    %67 = vector.broadcast %c8_i32 : i32 to vector<8x128xi32>
    %68 = arith.cmpi slt, %64, %67 : vector<8x128xi32>
    %69 = arith.andi %66, %68 : vector<8x128xi1>
    %70 = arith.select %69, %63, %55 : vector<8x128xi1>, vector<8x128xf32>
    %c0_32 = arith.constant 0 : index
    %c0_33 = arith.constant 0 : index
    %71 = vector.load %arg4[%c0_32, %c0_33] : memref<8x128xf32, #tpu.memory_space<vmem>>, vector<8x128xf32>
    tpu.vector_store %arg4[%c0_32, %c0_33], %70 {strides = array<i32>} : memref<8x128xf32, #tpu.memory_space<vmem>>, vector<8x128xf32>,
    return
  }
}

</mosaic_0001>

<bundles_post_ra>
// kernel: tpu_custom_call.1
= control target key start
LH: loop header
LB: loop body
LE: loop exit
PB: predicated region body
PF: predicated region fallthrough
CT: control target
= control target key end

     0   :  { %9 = vsyncpa [#allocation3], 0  ;;  %s945_s0 = inlined_call_operand.hbm [shape: f32[8,64], index: 0, kind: input, shape index: {}]   ;;  %s946_s1 = inlined_call_operand.hbm [shape: bf16[64,128], index: 1, kind: input, shape index: {}]   ;;  %s947_s2 = inlined_call_operand.hbm [shape: bf16[3,128,128], index: 2, kind: input, shape index: {}]   ;;  %s948_s3 = inlined_call_operand.vmem [shape: f32[8,128], index: 3, kind: input, shape index: {}]   ;;  %s949_s4 = inlined_call_operand.hbm [shape: f32[8,128], index: 4, kind: output, shape index: {}]  }
   0x1   :  { %10 = vsyncpa [#allocation6], 0 }
   0x2   :  { %11 = vsyncpa [#allocation4], 0  ;;  %s804_s15 = smov [#allocation5]   ;;  %s710_s19 = scalar_lea.hbm %s946_s1, 512 }
   0x3   :  { %s27_s16 = sshll.u32 %s804_s15, 4  ;;  %p711_p0 = scmp.ne.s32.totalorder %s946_s1, %s710_s19  ;;  %s28_s16 = int_to_ptr.vmem [resolvable:$true] %s27_s16 }
   0x4   :  { %p714_p1 = scmp.lt.u32.totalorder %s710_s19, %s946_s1 }
   0x6   :  { %p716_p2 = pnand %p714_p1, %p711_p0 }
   0x8   :  { %719 = shalt.err (!%p716_p2)
}
   0x9   :  { %s720_s24 = scalar_lea.vmem %s28_s16, 512  ;;  %p725_p4 = scmp.lt.s32.totalorder %s28_s16, %s28_s16 }
   0xa   :  { %p721_p3 = scmp.ne.s32.totalorder %s28_s16, %s720_s24  ;;  %p726_p5 = scmp.lt.s32.totalorder %s720_s24, %s720_s24 }
   0xc   :  { %p727_p6 = por %p726_p5, %p725_p4 }
   0xe   :  { %p728_p7 = pnand %p727_p6, %p721_p3 }
  0x10   :  { %731 = shalt.err (!%p728_p7)
}
  0x11   :  { %s805_s25 = smov 64   ;;  %s806_s26 = smov 4  }
  0x12   :  { %33 = dma.hbm_to_vmem [thread:$0]  %s946_s1, 512, %s28_s16, [#allocation6], %s805_s25, %s805_s25, %s806_s26  }
  0x13   :  { %s807_s29 = smov [#allocation2]   ;;  %s808_s5 = smov [#allocation7]  }
  0x14   :  { %s18_s30 = sshll.u32 %s807_s29, 4  ;;  %s39_s6 = sshll.u32 %s808_s5, 4  ;;  %s19_s30 = int_to_ptr.vmem [resolvable:$true] %s18_s30  ;;  %s40_s6 = int_to_ptr.vmem [resolvable:$true] %s39_s6 }
  0x15   :  { %s732_s9 = scalar_lea.hbm %s945_s0, 128 }
  0x16   :  { %p733_p8 = scmp.ne.s32.totalorder %s945_s0, %s732_s9  ;;  %p736_p9 = scmp.lt.u32.totalorder %s732_s9, %s945_s0 }
  0x18   :  { %p738_p10 = pnand %p736_p9, %p733_p8 }
  0x1a   :  { %741 = shalt.err (!%p738_p10)
}
  0x1b   :  { %s742_s1 = scalar_lea.vmem %s19_s30, 128  ;;  %p747_p12 = scmp.lt.s32.totalorder %s19_s30, %s19_s30 }
  0x1c   :  { %p743_p11 = scmp.ne.s32.totalorder %s19_s30, %s742_s1  ;;  %p748_p13 = scmp.lt.s32.totalorder %s742_s1, %s742_s1 }
  0x1e   :  { %p749_p0 = por %p748_p13, %p747_p12 }
  0x20   :  { %p750_p1 = pnand %p749_p0, %p743_p11 }
  0x22   :  { %753 = shalt.err (!%p750_p1)
}
  0x23   :  { %21 = dma.hbm_to_vmem [thread:$0]  %s945_s0, 128, %s19_s30, [#allocation3]  }
  0x24   :  { %s754_s18 = scalar_lea.hbm %s947_s2, 3072 }
  0x25   :  { %p755_p2 = scmp.ne.s32.totalorder %s947_s2, %s754_s18  ;;  %p758_p3 = scmp.lt.u32.totalorder %s754_s18, %s947_s2 }
  0x27   :  { %p760_p4 = pnand %p758_p3, %p755_p2 }
  0x29   :  { %763 = shalt.err (!%p760_p4)
}
  0x2a   :  { %s764_s23 = scalar_lea.vmem %s40_s6, 3072  ;;  %p769_p6 = scmp.lt.s32.totalorder %s40_s6, %s40_s6 }
  0x2b   :  { %p765_p5 = scmp.ne.s32.totalorder %s40_s6, %s764_s23  ;;  %p770_p7 = scmp.lt.s32.totalorder %s764_s23, %s764_s23 }
  0x2d   :  { %p771_p8 = por %p770_p7, %p769_p6 }
  0x2f   :  { %p772_p9 = pnand %p771_p8, %p765_p5 }
  0x31   :  { %775 = shalt.err (!%p772_p9)
}
  0x32   :  { %45 = dma.hbm_to_vmem [thread:$0]  %s947_s2, 3072, %s40_s6, [#allocation6], %s805_s25, %s805_s25, %s806_s26  }
  0x33   :  { %798 = dma.done.wait [#allocation3], 128  }
  0x34   :  { %799 = vsyncadd [#allocation3], 4294967168 }
  0x35   :  { %800 = dma.done.wait [#allocation6], 3584  }
  0x36   :  { %801 = vsyncadd [#allocation6], 4294963712  ;;  %v809_v0 = vmov 0.0   ;;  %vm810_vm0 = vmmov 0   ;;  %v676_v1 = vld [vmem:[#allocation5] sm:$0xff]   ;;  %v677_v2 = vld [vmem:[#allocation5 + $0x8] sm:$0xff]  }
  0x37   :  { %596 = vmatprep.subr.bf16.mxu0 %v809_v0  ;;  %604 = vmatprep.mubr.msk.bf16.mxu0 %vm810_vm0, %v809_v0  ;;  %v678_v3 = vld [vmem:[#allocation5 + $0x10] sm:$0xff]   ;;  %vm102_vm1 = vcmask 523264   ;;  %v679_v4 = vld [vmem:[#allocation5 + $0x18] sm:$0xff]   ;;  %v680_v7 = vld [vmem:[#allocation7] sm:$0xff]   ;;  %s811_s10 = smov [#allocation8]  }
  0x38   :  { %608 = vmatprep.subr.bf16.mxu1 %v809_v0  ;;  %624 = vmatprep.mubr.msk.bf16.mxu1 %vm810_vm0, %v809_v0  ;;  %v64_v5 = vld [vmem:[#allocation2] sm:$0xff]  ;;  %v681_v15 = vld [vmem:[#allocation7 + $0x8] sm:$0xff]   ;;  %v682_v16 = vld [vmem:[#allocation7 + $0x10] sm:$0xff]   ;;  %s519_s11 = sshll.u32 %s811_s10, 4  ;;  %s520_s11 = int_to_ptr.vmem [resolvable:$true] %s519_s11 }
  0x39   :  { %597 = vmatpush3.bf16.msra.mxu0 %v676_v1  ;;  %v65_v6 = vpack.c.bf16 %v64_v5, %v64_v5  ;;  %609 = vmatpush3.bf16.msra.mxu1 %v680_v7  ;;  %v529_v8 = vld [vmem:[%s948_s3] ss:$0 sm:$0xff]  ;;  %v684_v18 = vld [vmem:[#allocation7 + $0x20] sm:$0xff]   ;;  %v685_v19 = vld [vmem:[#allocation7 + $0x28] sm:$0xff]   ;;  %p781_p11 = scmp.lt.s32.totalorder %s520_s11, %s520_s11 }
  0x3a   :  { %598 = vmatprep.subr.bf16.mxu0 %v809_v0  ;;  %610 = vmatprep.subr.bf16.mxu1 %v809_v0  ;;  %v683_v17 = vld [vmem:[#allocation7 + $0x18] sm:$0xff]   ;;  %v686_v20 = vld [vmem:[#allocation7 + $0x30] sm:$0xff]   ;;  %v688_v22 = vld [vmem:[#allocation7 + $0x40] sm:$0xff]  }
  0x3b   :  { %v687_v21 = vld [vmem:[#allocation7 + $0x38] sm:$0xff]   ;;  %v689_v23 = vld [vmem:[#allocation7 + $0x48] sm:$0xff]   ;;  %v690_v24 = vld [vmem:[#allocation7 + $0x50] sm:$0xff]  }
  0x3c   :  { %v691_v25 = vld [vmem:[#allocation7 + $0x58] sm:$0xff]   ;;  %v692_v26 = vld [vmem:[#allocation7 + $0x60] sm:$0xff]   ;;  %v693_v27 = vld [vmem:[#allocation7 + $0x68] sm:$0xff]  }
  0x3d   :  { %599 = vmatpush3.bf16.msra.mxu0 %v677_v2  ;;  %611 = vmatpush3.bf16.msra.mxu1 %v681_v15  ;;  %v535_v37 = vld [vmem:[%s948_s3 + $0x1] ss:$0 sm:$0xff]  ;;  %v536_v39 = vld [vmem:[%s948_s3 + $0x2] ss:$0 sm:$0xff]  ;;  %v694_v43 = vld [vmem:[#allocation7 + $0x70] sm:$0xff]   ;;  %v506_v15 = vlaneseq }
  0x3e   :  { %600 = vmatprep.subr.bf16.mxu0 %v809_v0  ;;  %612 = vmatprep.subr.bf16.mxu1 %v809_v0  ;;  %v695_v44 = vld [vmem:[#allocation7 + $0x78] sm:$0xff]   ;;  %v696_v45 = vld [vmem:[#allocation7 + $0x80] sm:$0xff]   ;;  %v697_v46 = vld [vmem:[#allocation7 + $0x88] sm:$0xff]  }
  0x3f   :  { %v698_v47 = vld [vmem:[#allocation7 + $0x90] sm:$0xff]   ;;  %v699_v48 = vld [vmem:[#allocation7 + $0x98] sm:$0xff]   ;;  %v700_v49 = vld [vmem:[#allocation7 + $0xa0] sm:$0xff]  }
  0x40   :  { %v701_v50 = vld [vmem:[#allocation7 + $0xa8] sm:$0xff]   ;;  %v537_v51 = vld [vmem:[%s948_s3 + $0x3] ss:$0 sm:$0xff]  ;;  %v702_v59 = vld [vmem:[#allocation7 + $0xb0] sm:$0xff]  }
  0x41   :  { %601 = vmatpush3.bf16.msra.mxu0 %v678_v3  ;;  %613 = vmatpush3.bf16.msra.mxu1 %v682_v16  ;;  %v703_v60 = vld [vmem:[#allocation7 + $0xb8] sm:$0xff]  }
  0x42   :  { %602 = vmatprep.subr.bf16.mxu0 %v809_v0  ;;  %614 = vmatprep.subr.bf16.mxu1 %v809_v0  ;;  %v546_v61 = vld [vmem:[%s948_s3 + $0x4] ss:$0 sm:$0xff] }
  0x45   :  { %603 = vmatpush3.bf16.msra.mxu0 %v679_v4  ;;  %615 = vmatpush3.bf16.msra.mxu1 %v683_v17  ;;  %v507_v17 = vand.u32 127, %v506_v15 }
  0x46   :  { %628 = vmatprep.subr.bf16.mxu0 %v809_v0  ;;  %616 = vmatprep.subr.bf16.mxu1 %v809_v0 }
  0x47   :  { %vm508_vm2 = vcmp.ge.s32.totalorder %v507_v17, 4  ;;  %vm509_vm3 = vcmp.lt.s32.totalorder %v507_v17, 8 }
  0x48   :  { %605 = vmatmul.mubr.msk.bf16.vlgmr.msra.gmra.mrb[0].mxu0 %vm102_vm1, %v65_v6  ;;  %v555_v6 = vld [vmem:[%s948_s3 + $0x5] ss:$0 sm:$0xff]  ;;  %vm510_vm4 = vmand %vm508_vm2, %vm509_vm3  ;;  %s776_s3 = scalar_lea.vmem %s520_s11, 128 }
  0x49   :  { %644 = vmatprep.mubr.msk.bf16.mxu0 %vm810_vm0, %v809_v0  ;;  %617 = vmatpush3.bf16.msra.mxu1 %v684_v18  ;;  %p777_p10 = scmp.ne.s32.totalorder %s520_s11, %s776_s3  ;;  %p782_p12 = scmp.lt.s32.totalorder %s776_s3, %s776_s3 }
  0x4a   :  { %618 = vmatprep.subr.bf16.mxu1 %v809_v0  ;;  %629 = vmatpush3.bf16.msra.mxu0 %v688_v22 }
  0x4b   :  { %630 = vmatprep.subr.bf16.mxu0 %v809_v0  ;;  %p783_p13 = por %p782_p12, %p781_p11 }
  0x4d   :  { %619 = vmatpush3.bf16.msra.mxu1 %v685_v19  ;;  %p784_p0 = pnand %p783_p13, %p777_p10 }
  0x4e   :  { %620 = vmatprep.subr.bf16.mxu1 %v809_v0  ;;  %631 = vmatpush3.bf16.msra.mxu0 %v689_v23 }
  0x4f   :  { %632 = vmatprep.subr.bf16.mxu0 %v809_v0 }
  0x51   :  { %621 = vmatpush3.bf16.msra.mxu1 %v686_v20 }
  0x52   :  { %622 = vmatprep.subr.bf16.mxu1 %v809_v0  ;;  %633 = vmatpush3.bf16.msra.mxu0 %v690_v24 }
  0x53   :  { %634 = vmatprep.subr.bf16.mxu0 %v809_v0 }
  0x55   :  { %623 = vmatpush3.bf16.msra.mxu1 %v687_v21 }
  0x56   :  { %648 = vmatprep.subr.bf16.mxu1 %v809_v0  ;;  %635 = vmatpush3.bf16.msra.mxu0 %v691_v25 }
  0x57   :  { %636 = vmatprep.subr.bf16.mxu0 %v809_v0 }
  0x5a   :  { %637 = vmatpush3.bf16.msra.mxu0 %v692_v26 }
  0x5b   :  { %638 = vmatprep.subr.bf16.mxu0 %v809_v0 }
  0x5e   :  { %639 = vmatpush3.bf16.msra.mxu0 %v693_v27 }
  0x5f   :  { %640 = vmatprep.subr.bf16.mxu0 %v809_v0 }
  0x62   :  { %641 = vmatpush3.bf16.msra.mxu0 %v694_v43 }
  0x63   :  { %642 = vmatprep.subr.bf16.mxu0 %v809_v0 }
  0x66   :  { %643 = vmatpush3.bf16.msra.mxu0 %v695_v44 }
 0x11b   :  { %v140_v9 = vpop.f32.mrb[0].mxu0 }
 0x11c   :  { %v141_v10 = vadd.f32 %v529_v8, %v140_v9  ;;  %v606_v11 = vpop.f32.mrb[1].mxu0 }
 0x11d   :  { %v143_v12 = vpop.f32.mrb[2].mxu0 }
 0x11e   :  { %v607_v13 = vpop.f32.mrb[3].mxu0  ;;  %146 = vadd.xlane.f32.xlu0 %v141_v10  ;;  %v149_v14 = vmul.f32 %v141_v10, %v141_v10 }
 0x122   :  { %150 = vadd.xlane.f32.xlu0 %v149_v14 }
 0x1ab   :  { %v147_v28 = vpop.xlane.xlu0 %146 }
 0x1ac   :  { %v148_v29 = vmul.f32 0.03125, %v147_v28 }
 0x1ae   :  { %v153_v31 = vmul.f32 %v148_v29, %v148_v29  ;;  %v155_v35 = vsub.f32 %v141_v10, %v148_v29 }
 0x1af   :  { %v151_v30 = vpop.xlane.xlu0 %150 }
 0x1b0   :  { %v152_v32 = vmul.f32 0.03125, %v151_v30 }
 0x1b2   :  { %v154_v33 = vsub.f32 %v152_v32, %v153_v31 }
 0x1b4   :  { %v156_v34 = vadd.f32 1e-05, %v154_v33 }
 0x1b6   :  { %704 = vrsqrt.f32 %v156_v34 }
 0x1c0   :  { %v705_v36 = vpop.eup %704 }
 0x1c1   :  { %v158_v38 = vmul.f32 %v705_v36, %v155_v35 }
 0x1c3   :  { %v163_v40 = vmul.f32 %v535_v37, %v158_v38 }
 0x1c5   :  { %v168_v41 = vadd.f32 %v536_v39, %v163_v40 }
 0x1c7   :  { %v169_v42 = vpack.c.bf16 %v168_v41, %v168_v41 }
 0x1c9   :  { %625 = vmatmul.mubr.bf16.vlgmr.msra.gmra.mrb[0].mxu1 %v169_v42 }
 0x1ca   :  { %664 = vmatprep.mubr.msk.bf16.mxu1 %vm810_vm0, %v809_v0  ;;  %649 = vmatpush3.bf16.msra.mxu1 %v696_v45 }
 0x1cb   :  { %650 = vmatprep.subr.bf16.mxu1 %v809_v0 }
 0x1ce   :  { %651 = vmatpush3.bf16.msra.mxu1 %v697_v46 }
 0x1cf   :  { %652 = vmatprep.subr.bf16.mxu1 %v809_v0 }
 0x1d2   :  { %653 = vmatpush3.bf16.msra.mxu1 %v698_v47 }
 0x1d3   :  { %654 = vmatprep.subr.bf16.mxu1 %v809_v0 }
 0x1d6   :  { %655 = vmatpush3.bf16.msra.mxu1 %v699_v48 }
 0x1d7   :  { %656 = vmatprep.subr.bf16.mxu1 %v809_v0 }
 0x1da   :  { %657 = vmatpush3.bf16.msra.mxu1 %v700_v49 }
 0x1db   :  { %658 = vmatprep.subr.bf16.mxu1 %v809_v0 }
 0x1de   :  { %659 = vmatpush3.bf16.msra.mxu1 %v701_v50 }
 0x1df   :  { %660 = vmatprep.subr.bf16.mxu1 %v809_v0 }
 0x1e2   :  { %661 = vmatpush3.bf16.msra.mxu1 %v702_v59 }
 0x1e3   :  { %662 = vmatprep.subr.bf16.mxu1 %v809_v0 }
 0x1e6   :  { %663 = vmatpush3.bf16.msra.mxu1 %v703_v60 }
 0x29c   :  { %v272_v52 = vpop.f32.mrb[0].mxu1 }
 0x29d   :  { %v273_v53 = vadd.f32 %v537_v51, %v272_v52  ;;  %v626_v54 = vpop.f32.mrb[1].mxu1 }
 0x29e   :  { %v275_v55 = vpop.f32.mrb[2].mxu1 }
 0x29f   :  { %v278_v56 = vmax.f32 %v273_v53, 0.0  ;;  %v627_v57 = vpop.f32.mrb[3].mxu1 }
 0x2a1   :  { %v279_v58 = vpack.c.bf16 %v278_v56, %v278_v56 }
 0x2a3   :  { %645 = vmatmul.mubr.bf16.vlgmr.msra.gmra.mrb[4].mxu0 %v279_v58 }
 0x376   :  { %v383_v62 = vpop.f32.mrb[4].mxu0 }
 0x377   :  { %v384_v63 = vadd.f32 %v546_v61, %v383_v62  ;;  %v646_v1 = vpop.f32.mrb[5].mxu0 }
 0x378   :  { %v386_v2 = vpop.f32.mrb[6].mxu0 }
 0x379   :  { %v389_v3 = vmax.f32 %v384_v63, 0.0  ;;  %v647_v4 = vpop.f32.mrb[7].mxu0 }
 0x37b   :  { %v390_v5 = vpack.c.bf16 %v389_v3, %v389_v3 }
 0x37d   :  { %665 = vmatmul.mubr.bf16.vlgmr.msra.gmra.mrb[4].mxu1 %v390_v5 }
 0x450   :  { %v494_v7 = vpop.f32.mrb[4].mxu1 }
 0x451   :  { %v495_v0 = vadd.f32 %v555_v6, %v494_v7  ;;  %v666_v8 = vpop.f32.mrb[5].mxu1 }
 0x452   :  { %v497_v9 = vpop.f32.mrb[6].mxu1 }
 0x453   :  { %706 = vtanh.f32 %v495_v0  ;;  %v667_v10 = vpop.f32.mrb[7].mxu1 }
 0x45d   :  { %v707_v11 = vpop.eup %706 }
 0x45e   :  { %v501_v12 = vadd.f32 1.0, %v707_v11 }
 0x460   :  { %v502_v13 = vmul.f32 6.0, %v501_v12 }
 0x462   :  { %v503_v14 = vadd.f32 -10.0, %v502_v13 }
 0x464   :  { %v504_v16 = vmul.f32 1.442695, %v503_v14 }
 0x466   :  { %708 = vpow2.f32 %v504_v16 }
 0x470   :  { %v709_v18 = vpop.eup %708 }
 0x471   :  { %v511_v19 = vsel %vm510_vm4, %v709_v18, %v495_v0 }
 0x472   :  { %512 = vst [vmem:[#allocation8] sm:$0xff] %v511_v19 }
 0x473   :  { %787 = shalt.err (!%p784_p0)
}
 0x474   :  { %s788_s1 = scalar_lea.hbm %s949_s4, 128 }
 0x475   :  { %p789_p1 = scmp.ne.s32.totalorder %s949_s4, %s788_s1  ;;  %p792_p2 = scmp.lt.u32.totalorder %s788_s1, %s949_s4 }
 0x477   :  { %p794_p3 = pnand %p792_p2, %p789_p1 }
 0x479   :  { %797 = shalt.err (!%p794_p3)
}
 0x47a   :  { %522 = dma.vmem_to_hbm [thread:$0]  %s520_s11, 128, %s949_s4, [#allocation4]  }
 0x47b   :  { %802 = dma.done.wait [#allocation4], 128  }
 0x47c   :  { %803 = vsyncadd [#allocation4], 4294967168 }
 0x47d   :  { %526 = vsyncpa [#allocation3], 1 }
 0x47e   :  { %527 = vsyncpa [#allocation6], 1 }
 0x47f   :  { %528 = vsyncpa [#allocation4], 1 }

</bundles_post_ra>
